<compile_context>
chip_gen: v5e
topology: v5e:2x2
jax: 0.10.0
libtpu: 0.0.40
codegen_flags: <defaults>
</compile_context>

<pallas_src>
import jax
import jax.numpy as jnp
import numpy as np
from jax.experimental import pallas as pl
from jax.experimental.pallas import tpu as pltpu

_LANE = 128
_SUBLANE = 8
_VMEM_BUDGET = 40 * 1024 * 1024   # per-step budget, sized for v7x's 64 MiB VMEM


def _round_up(x, m):
    return ((x + m - 1) // m) * m


def _pad2d(a, rows, cols):
    return jnp.pad(a, ((0, rows - a.shape[0]), (0, cols - a.shape[1])))


def _discriminator_kernel(feat_ref, hint_ref,
                          w1a_ref, w1b_ref, b1_ref,
                          w2_ref, b2_ref,
                          w3_ref, b3_ref,
                          out_ref):
    """One (tb, Fp) batch tile of the GAIN discriminator MLP."""
    # concat([feat, hint], axis=1) @ W1 == feat @ W1[:F] + hint @ W1[F:]
    h1 = jnp.dot(feat_ref[...], w1a_ref[...], preferred_element_type=jnp.float32)
    h1 = h1 + jnp.dot(hint_ref[...], w1b_ref[...], preferred_element_type=jnp.float32)
    h1 = jnp.maximum(h1 + b1_ref[...], 0.0)                       # bias (1,H1p) broadcasts

    h2 = jnp.dot(h1, w2_ref[...], preferred_element_type=jnp.float32) + b2_ref[...]
    h2 = jnp.maximum(h2, 0.0)

    logits = jnp.dot(h2, w3_ref[...], preferred_element_type=jnp.float32) + b3_ref[...]
    out_ref[...] = jax.nn.sigmoid(logits).astype(out_ref.dtype)


def discriminator_forward(features_combined, hint, params, *, block_batch=512):
    """Pallas wrapper: pads lane dims to 128, tiles the batch, runs the fused MLP."""
    w1, b1, w2, b2, w3, b3 = params
    B, F = features_combined.shape
    assert hint.shape == (B, F)
    H1 = w1.shape[1]
    H2 = w2.shape[1]
    assert w1.shape == (2 * F, H1) and w2.shape == (H1, H2) and w3.shape == (H2, F)

    # ---- lane padding -> dense MXU passes & unmasked output stores ------------
    Fp = _round_up(F, _LANE)
    H1p = _round_up(H1, _LANE)
    H2p = _round_up(H2, _LANE)

    # ---- batch tile: multiple of 8, shrunk until the per-step VMEM footprint
    # ---- (double-buffered activation tiles + resident weights) fits the budget.
    tb = max(_SUBLANE, min(_round_up(block_batch, _SUBLANE), _round_up(B, _SUBLANE)))

    def vmem_bytes(t):
        acts = 2 * (2 * t * Fp + t * Fp) * 4                    # dbl-buffered in/out tiles
        live = (t * H1p + t * H2p + t * Fp) * 4                 # h1 / h2 / logits values
        wgts = 2 * (2 * Fp * H1p + H1p * H2p + H2p * Fp
                    + H1p + H2p + Fp) * 4                       # worst case: dbl-buffered
        return acts + live + wgts

    while tb > _SUBLANE and vmem_bytes(tb) > _VMEM_BUDGET:
        tb = max(_SUBLANE, _round_up(tb // 2, _SUBLANE))

    Bp = _round_up(B, tb)
    grid = (Bp // tb,)

    # ---- pad operands once in the wrapper (W1 split here, not in the kernel) --
    feat_p = _pad2d(features_combined.astype(jnp.float32), Bp, Fp)
    hint_p = _pad2d(hint.astype(jnp.float32), Bp, Fp)
    w1a_p = _pad2d(w1[:F, :].astype(jnp.float32), Fp, H1p)
    w1b_p = _pad2d(w1[F:, :].astype(jnp.float32), Fp, H1p)
    w2_p = _pad2d(w2.astype(jnp.float32), H1p, H2p)
    w3_p = _pad2d(w3.astype(jnp.float32), H2p, Fp)
    b1_p = _pad2d(b1.reshape(1, H1).astype(jnp.float32), 1, H1p)
    b2_p = _pad2d(b2.reshape(1, H2).astype(jnp.float32), 1, H2p)
    b3_p = _pad2d(b3.reshape(1, F).astype(jnp.float32), 1, Fp)

    # ---- advisory cost estimate for the XLA scheduler --------------------------
    flops = 2 * Bp * (2 * Fp * H1p + H1p * H2p + H2p * Fp)
    bytes_accessed = 4 * (3 * Bp * Fp                              # feat, hint, out
                          + 2 * Fp * H1p + H1p * H2p + H2p * Fp    # weights
                          + H1p + H2p + Fp)                        # biases
    cost = pl.CostEstimate(flops=flops, transcendentals=Bp * Fp,
                           bytes_accessed=bytes_accessed)

    vmem_limit = min(48 * 1024 * 1024,
                     max(16 * 1024 * 1024, int(1.5 * vmem_bytes(tb))))

    def run(single_buffer_weights):
        if single_buffer_weights:
            # Weights/biases never change block index -> one VMEM copy is enough.
            wkw = dict(pipeline_mode=pl.Buffered(buffer_count=1))
        else:
            wkw = {}
        in_specs = [
            pl.BlockSpec((tb, Fp), lambda i: (i, 0)),              # features tile
            pl.BlockSpec((tb, Fp), lambda i: (i, 0)),              # hint tile
            pl.BlockSpec((Fp, H1p), lambda i: (0, 0), **wkw),      # W1[:F]   (resident)
            pl.BlockSpec((Fp, H1p), lambda i: (0, 0), **wkw),      # W1[F:]   (resident)
            pl.BlockSpec((1, H1p), lambda i: (0, 0), **wkw),       # b1
            pl.BlockSpec((H1p, H2p), lambda i: (0, 0), **wkw),     # W2
            pl.BlockSpec((1, H2p), lambda i: (0, 0), **wkw),       # b2
            pl.BlockSpec((H2p, Fp), lambda i: (0, 0), **wkw),      # W3
            pl.BlockSpec((1, Fp), lambda i: (0, 0), **wkw),        # b3
        ]
        call = pl.pallas_call(
            _discriminator_kernel,
            out_shape=jax.ShapeDtypeStruct((Bp, Fp), jnp.float32),
            grid_spec=pltpu.PrefetchScalarGridSpec(
                num_scalar_prefetch=0,
                grid=grid,
                in_specs=in_specs,
                out_specs=pl.BlockSpec((tb, Fp), lambda i: (i, 0)),
            ),
            compiler_params=pltpu.CompilerParams(
                dimension_semantics=("parallel",),
                vmem_limit_bytes=vmem_limit),
            cost_estimate=cost,
        )
        return call(feat_p, hint_p, w1a_p, w1b_p, b1_p, w2_p, b2_p, w3_p, b3_p)

    try:
        out_p = run(True)
    except Exception:
        # pl.Buffered(1) unsupported on this JAX version/backend: fall back to
        # default double-buffered weight specs (correctness unaffected).
        out_p = run(False)

    return out_p[:B, :F]


def init_params(key, *, number_features, hidden_dimension_1, hidden_dimension_2):
    """Deterministic xavier-style init matching the PyTorch module's __init__."""
    def xavier(k, size):
        std = 1.0 / np.sqrt(size[0] / 2.0)
        return jax.random.normal(k, size, dtype=jnp.float32) * std

    k1, k2, k3 = jax.random.split(key, 3)
    w1 = xavier(k1, (number_features * 2, hidden_dimension_1))
    w2 = xavier(k2, (hidden_dimension_1, hidden_dimension_2))
    w3 = xavier(k3, (hidden_dimension_2, number_features))
    b1 = jnp.zeros((hidden_dimension_1,), jnp.float32)
    b2 = jnp.zeros((hidden_dimension_2,), jnp.float32)
    b3 = jnp.zeros((number_features,), jnp.float32)
    return (w1, b1, w2, b2, w3, b3)


def reference_forward(features_combined, hint, params):
    """Pure-JAX reference for correctness check."""
    w1, b1, w2, b2, w3, b3 = params
    x = jnp.concatenate([features_combined, hint], axis=1)
    h1 = jax.nn.relu(x @ w1 + b1)
    h2 = jax.nn.relu(h1 @ w2 + b2)
    return jax.nn.sigmoid(h2 @ w3 + b3)


if __name__ == "__main__":
    B = 20                      # batch (not a multiple of 8 -> exercises padding)
    F = 16                      # number_features
    H1, H2 = 40, 24             # hidden dimensions (non-128 -> exercises lane padding)

    key = jax.random.PRNGKey(0)
    k_params, k_feat, k_hint = jax.random.split(key, 3)

    params = init_params(k_params, number_features=F,
                         hidden_dimension_1=H1, hidden_dimension_2=H2)
    features_combined = jax.random.normal(k_feat, (B, F), dtype=jnp.float32)
    hint = (jax.random.uniform(k_hint, (B, F)) > 0.5).astype(jnp.float32)

    ref = reference_forward(features_combined, hint, params)

    # Default tiling (single batch tile at this tiny size).
    out = jax.block_until_ready(discriminator_forward(features_combined, hint, params))
    np.testing.assert_allclose(np.asarray(out), np.asarray(ref), rtol=1e-5, atol=1e-5)
    assert out.shape == (B, F)

    # Multi-step grid + padded remainder tile (exercises the batch-tiling path).
    out_tiled = jax.block_until_ready(
        discriminator_forward(features_combined, hint, params, block_batch=8))
    np.testing.assert_allclose(np.asarray(out_tiled), np.asarray(ref),
                               rtol=1e-5, atol=1e-5)

    print("KERNEL_OK")
</pallas_src>

<mosaic_0001>
module attributes {stable_mosaic.version = 11 : i64} {
  func.func @_discriminator_kernel(%arg0: i32, %arg1: memref<24x128xf32, #tpu.memory_space<vmem>>, %arg2: memref<24x128xf32, #tpu.memory_space<vmem>>, %arg3: memref<128x128xf32, #tpu.memory_space<vmem>>, %arg4: memref<128x128xf32, #tpu.memory_space<vmem>>, %arg5: memref<1x128xf32, #tpu.memory_space<vmem>>, %arg6: memref<128x128xf32, #tpu.memory_space<vmem>>, %arg7: memref<1x128xf32, #tpu.memory_space<vmem>>, %arg8: memref<128x128xf32, #tpu.memory_space<vmem>>, %arg9: memref<1x128xf32, #tpu.memory_space<vmem>>, %arg10: memref<24x128xf32, #tpu.memory_space<vmem>>) attributes {dimension_semantics = [#tpu.dimension_semantics<parallel>], iteration_bounds = array<i64: 1>, scalar_prefetch = 0 : i64, scratch_operands = 0 : i64, tpu.core_type = #tpu.core_type<tc>, window_params = [{transform_indices = @transform_0, window_bounds = array<i64: 24, 128>}, {transform_indices = @transform_1, window_bounds = array<i64: 24, 128>}, {pipeline_mode = #tpu.pipeline_mode<synchronous>, transform_indices = @transform_2, window_bounds = array<i64: 128, 128>}, {pipeline_mode = #tpu.pipeline_mode<synchronous>, transform_indices = @transform_3, window_bounds = array<i64: 128, 128>}, {pipeline_mode = #tpu.pipeline_mode<synchronous>, transform_indices = @transform_4, window_bounds = array<i64: 1, 128>}, {pipeline_mode = #tpu.pipeline_mode<synchronous>, transform_indices = @transform_5, window_bounds = array<i64: 128, 128>}, {pipeline_mode = #tpu.pipeline_mode<synchronous>, transform_indices = @transform_6, window_bounds = array<i64: 1, 128>}, {pipeline_mode = #tpu.pipeline_mode<synchronous>, transform_indices = @transform_7, window_bounds = array<i64: 128, 128>}, {pipeline_mode = #tpu.pipeline_mode<synchronous>, transform_indices = @transform_8, window_bounds = array<i64: 1, 128>}, {transform_indices = @transform_9, window_bounds = array<i64: 24, 128>}]} {
    %c0 = arith.constant 0 : index
    %c0_0 = arith.constant 0 : index
    %0 = vector.load %arg1[%c0, %c0_0] : memref<24x128xf32, #tpu.memory_space<vmem>>, vector<24x128xf32>
    %c0_1 = arith.constant 0 : index
    %c0_2 = arith.constant 0 : index
    %1 = vector.load %arg3[%c0_1, %c0_2] : memref<128x128xf32, #tpu.memory_space<vmem>>, vector<128x128xf32>
    %cst = arith.constant dense<0.000000e+00> : vector<24x128xf32>
    %2 = tpu.matmul %0, %1, %cst {dimension_numbers = #tpu.dot_dimension_numbers<[1], [0], [0], [1], [0, 0, 1, 1], [], []>} : vector<24x128xf32>, vector<128x128xf32>, vector<24x128xf32> -> vector<24x128xf32>
    %c0_3 = arith.constant 0 : index
    %c0_4 = arith.constant 0 : index
    %3 = vector.load %arg2[%c0_3, %c0_4] : memref<24x128xf32, #tpu.memory_space<vmem>>, vector<24x128xf32>
    %c0_5 = arith.constant 0 : index
    %c0_6 = arith.constant 0 : index
    %4 = vector.load %arg4[%c0_5, %c0_6] : memref<128x128xf32, #tpu.memory_space<vmem>>, vector<128x128xf32>
    %cst_7 = arith.constant dense<0.000000e+00> : vector<24x128xf32>
    %5 = tpu.matmul %3, %4, %cst_7 {dimension_numbers = #tpu.dot_dimension_numbers<[1], [0], [0], [1], [0, 0, 1, 1], [], []>} : vector<24x128xf32>, vector<128x128xf32>, vector<24x128xf32> -> vector<24x128xf32>
    %6 = arith.addf %2, %5 : vector<24x128xf32>
    %c0_8 = arith.constant 0 : index
    %c0_9 = arith.constant 0 : index
    %7 = vector.load %arg5[%c0_8, %c0_9] : memref<1x128xf32, #tpu.memory_space<vmem>>, vector<1x128xf32>
    %8 = vector.broadcast %7 : vector<1x128xf32> to vector<24x128xf32>
    %9 = arith.addf %6, %8 : vector<24x128xf32>
    %cst_10 = arith.constant 0.000000e+00 : f32
    %10 = vector.broadcast %cst_10 : f32 to vector<24x128xf32>
    %11 = arith.maximumf %9, %10 : vector<24x128xf32>
    %c0_11 = arith.constant 0 : index
    %c0_12 = arith.constant 0 : index
    %12 = vector.load %arg6[%c0_11, %c0_12] : memref<128x128xf32, #tpu.memory_space<vmem>>, vector<128x128xf32>
    %cst_13 = arith.constant dense<0.000000e+00> : vector<24x128xf32>
    %13 = tpu.matmul %11, %12, %cst_13 {dimension_numbers = #tpu.dot_dimension_numbers<[1], [0], [0], [1], [0, 0, 1, 1], [], []>} : vector<24x128xf32>, vector<128x128xf32>, vector<24x128xf32> -> vector<24x128xf32>
    %c0_14 = arith.constant 0 : index
    %c0_15 = arith.constant 0 : index
    %14 = vector.load %arg7[%c0_14, %c0_15] : memref<1x128xf32, #tpu.memory_space<vmem>>, vector<1x128xf32>
    %15 = vector.broadcast %14 : vector<1x128xf32> to vector<24x128xf32>
    %16 = arith.addf %13, %15 : vector<24x128xf32>
    %cst_16 = arith.constant 0.000000e+00 : f32
    %17 = vector.broadcast %cst_16 : f32 to vector<24x128xf32>
    %18 = arith.maximumf %16, %17 : vector<24x128xf32>
    %c0_17 = arith.constant 0 : index
    %c0_18 = arith.constant 0 : index
    %19 = vector.load %arg8[%c0_17, %c0_18] : memref<128x128xf32, #tpu.memory_space<vmem>>, vector<128x128xf32>
    %cst_19 = arith.constant dense<0.000000e+00> : vector<24x128xf32>
    %20 = tpu.matmul %18, %19, %cst_19 {dimension_numbers = #tpu.dot_dimension_numbers<[1], [0], [0], [1], [0, 0, 1, 1], [], []>} : vector<24x128xf32>, vector<128x128xf32>, vector<24x128xf32> -> vector<24x128xf32>
    %c0_20 = arith.constant 0 : index
    %c0_21 = arith.constant 0 : index
    %21 = vector.load %arg9[%c0_20, %c0_21] : memref<1x128xf32, #tpu.memory_space<vmem>>, vector<1x128xf32>
    %22 = vector.broadcast %21 : vector<1x128xf32> to vector<24x128xf32>
    %23 = arith.addf %20, %22 : vector<24x128xf32>
    %24 = arith.negf %23 : vector<24x128xf32>
    %25 = math.exp %24 : vector<24x128xf32>
    %cst_22 = arith.constant 1.000000e+00 : f32
    %26 = vector.broadcast %cst_22 : f32 to vector<24x128xf32>
    %27 = arith.addf %26, %25 : vector<24x128xf32>
    %28 = arith.divf %26, %27 : vector<24x128xf32>
    %c0_23 = arith.constant 0 : index
    %c0_24 = arith.constant 0 : index
    %29 = vector.load %arg10[%c0_23, %c0_24] : memref<24x128xf32, #tpu.memory_space<vmem>>, vector<24x128xf32>
    tpu.vector_store %arg10[%c0_23, %c0_24], %28 {strides = array<i32>} : memref<24x128xf32, #tpu.memory_space<vmem>>, vector<24x128xf32>,
    return
  }
  func.func @transform_0(%arg0: i32) -> (i32, i32) {
    %c0_i32 = arith.constant 0 : i32
    %c0_i32_0 = arith.constant 0 : i32
    return %arg0, %c0_i32 : i32, i32
  }
  func.func @transform_1(%arg0: i32) -> (i32, i32) {
    %c0_i32 = arith.constant 0 : i32
    %c0_i32_0 = arith.constant 0 : i32
    return %arg0, %c0_i32 : i32, i32
  }
  func.func @transform_2(%arg0: i32) -> (i32, i32) {
    %c0_i32 = arith.constant 0 : i32
    %c0_i32_0 = arith.constant 0 : i32
    %c0_i32_1 = arith.constant 0 : i32
    return %c0_i32, %c0_i32_0 : i32, i32
  }
  func.func @transform_3(%arg0: i32) -> (i32, i32) {
    %c0_i32 = arith.constant 0 : i32
    %c0_i32_0 = arith.constant 0 : i32
    %c0_i32_1 = arith.constant 0 : i32
    return %c0_i32, %c0_i32_0 : i32, i32
  }
  func.func @transform_4(%arg0: i32) -> (i32, i32) {
    %c0_i32 = arith.constant 0 : i32
    %c0_i32_0 = arith.constant 0 : i32
    %c0_i32_1 = arith.constant 0 : i32
    return %c0_i32, %c0_i32_0 : i32, i32
  }
  func.func @transform_5(%arg0: i32) -> (i32, i32) {
    %c0_i32 = arith.constant 0 : i32
    %c0_i32_0 = arith.constant 0 : i32
    %c0_i32_1 = arith.constant 0 : i32
    return %c0_i32, %c0_i32_0 : i32, i32
  }
  func.func @transform_6(%arg0: i32) -> (i32, i32) {
    %c0_i32 = arith.constant 0 : i32
    %c0_i32_0 = arith.constant 0 : i32
    %c0_i32_1 = arith.constant 0 : i32
    return %c0_i32, %c0_i32_0 : i32, i32
  }
  func.func @transform_7(%arg0: i32) -> (i32, i32) {
    %c0_i32 = arith.constant 0 : i32
    %c0_i32_0 = arith.constant 0 : i32
    %c0_i32_1 = arith.constant 0 : i32
    return %c0_i32, %c0_i32_0 : i32, i32
  }
  func.func @transform_8(%arg0: i32) -> (i32, i32) {
    %c0_i32 = arith.constant 0 : i32
    %c0_i32_0 = arith.constant 0 : i32
    %c0_i32_1 = arith.constant 0 : i32
    return %c0_i32, %c0_i32_0 : i32, i32
  }
  func.func @transform_9(%arg0: i32) -> (i32, i32) {
    %c0_i32 = arith.constant 0 : i32
    %c0_i32_0 = arith.constant 0 : i32
    return %arg0, %c0_i32 : i32, i32
  }
}

module attributes {stable_mosaic.version = 11 : i64} {
  func.func @_discriminator_kernel(%arg0: i32, %arg1: memref<24x128xf32, #tpu.memory_space<vmem>>, %arg2: memref<24x128xf32, #tpu.memory_space<vmem>>, %arg3: memref<128x128xf32, #tpu.memory_space<vmem>>, %arg4: memref<128x128xf32, #tpu.memory_space<vmem>>, %arg5: memref<1x128xf32, #tpu.memory_space<vmem>>, %arg6: memref<128x128xf32, #tpu.memory_space<vmem>>, %arg7: memref<1x128xf32, #tpu.memory_space<vmem>>, %arg8: memref<128x128xf32, #tpu.memory_space<vmem>>, %arg9: memref<1x128xf32, #tpu.memory_space<vmem>>, %arg10: memref<24x128xf32, #tpu.memory_space<vmem>>) attributes {dimension_semantics = [#tpu.dimension_semantics<parallel>], iteration_bounds = array<i64: 1>, scalar_prefetch = 0 : i64, scratch_operands = 0 : i64, tpu.core_type = #tpu.core_type<tc>, window_params = [{transform_indices = @transform_0, window_bounds = array<i64: 24, 128>}, {transform_indices = @transform_1, window_bounds = array<i64: 24, 128>}, {pipeline_mode = #tpu.pipeline_mode<synchronous>, transform_indices = @transform_2, window_bounds = array<i64: 128, 128>}, {pipeline_mode = #tpu.pipeline_mode<synchronous>, transform_indices = @transform_3, window_bounds = array<i64: 128, 128>}, {pipeline_mode = #tpu.pipeline_mode<synchronous>, transform_indices = @transform_4, window_bounds = array<i64: 1, 128>}, {pipeline_mode = #tpu.pipeline_mode<synchronous>, transform_indices = @transform_5, window_bounds = array<i64: 128, 128>}, {pipeline_mode = #tpu.pipeline_mode<synchronous>, transform_indices = @transform_6, window_bounds = array<i64: 1, 128>}, {pipeline_mode = #tpu.pipeline_mode<synchronous>, transform_indices = @transform_7, window_bounds = array<i64: 128, 128>}, {pipeline_mode = #tpu.pipeline_mode<synchronous>, transform_indices = @transform_8, window_bounds = array<i64: 1, 128>}, {transform_indices = @transform_9, window_bounds = array<i64: 24, 128>}]} {
    %c0 = arith.constant 0 : index
    %c0_0 = arith.constant 0 : index
    %0 = vector.load %arg1[%c0, %c0_0] : memref<24x128xf32, #tpu.memory_space<vmem>>, vector<24x128xf32>
    %c0_1 = arith.constant 0 : index
    %c0_2 = arith.constant 0 : index
    %1 = vector.load %arg3[%c0_1, %c0_2] : memref<128x128xf32, #tpu.memory_space<vmem>>, vector<128x128xf32>
    %cst = arith.constant dense<0.000000e+00> : vector<24x128xf32>
    %2 = tpu.matmul %0, %1, %cst {dimension_numbers = #tpu.dot_dimension_numbers<[1], [0], [0], [1], [0, 0, 1, 1], [], []>} : vector<24x128xf32>, vector<128x128xf32>, vector<24x128xf32> -> vector<24x128xf32>
    %c0_3 = arith.constant 0 : index
    %c0_4 = arith.constant 0 : index
    %3 = vector.load %arg2[%c0_3, %c0_4] : memref<24x128xf32, #tpu.memory_space<vmem>>, vector<24x128xf32>
    %c0_5 = arith.constant 0 : index
    %c0_6 = arith.constant 0 : index
    %4 = vector.load %arg4[%c0_5, %c0_6] : memref<128x128xf32, #tpu.memory_space<vmem>>, vector<128x128xf32>
    %cst_7 = arith.constant dense<0.000000e+00> : vector<24x128xf32>
    %5 = tpu.matmul %3, %4, %cst_7 {dimension_numbers = #tpu.dot_dimension_numbers<[1], [0], [0], [1], [0, 0, 1, 1], [], []>} : vector<24x128xf32>, vector<128x128xf32>, vector<24x128xf32> -> vector<24x128xf32>
    %6 = arith.addf %2, %5 : vector<24x128xf32>
    %c0_8 = arith.constant 0 : index
    %c0_9 = arith.constant 0 : index
    %7 = vector.load %arg5[%c0_8, %c0_9] : memref<1x128xf32, #tpu.memory_space<vmem>>, vector<1x128xf32>
    %8 = vector.broadcast %7 : vector<1x128xf32> to vector<24x128xf32>
    %9 = arith.addf %6, %8 : vector<24x128xf32>
    %cst_10 = arith.constant 0.000000e+00 : f32
    %10 = vector.broadcast %cst_10 : f32 to vector<24x128xf32>
    %11 = arith.maximumf %9, %10 : vector<24x128xf32>
    %c0_11 = arith.constant 0 : index
    %c0_12 = arith.constant 0 : index
    %12 = vector.load %arg6[%c0_11, %c0_12] : memref<128x128xf32, #tpu.memory_space<vmem>>, vector<128x128xf32>
    %cst_13 = arith.constant dense<0.000000e+00> : vector<24x128xf32>
    %13 = tpu.matmul %11, %12, %cst_13 {dimension_numbers = #tpu.dot_dimension_numbers<[1], [0], [0], [1], [0, 0, 1, 1], [], []>} : vector<24x128xf32>, vector<128x128xf32>, vector<24x128xf32> -> vector<24x128xf32>
    %c0_14 = arith.constant 0 : index
    %c0_15 = arith.constant 0 : index
    %14 = vector.load %arg7[%c0_14, %c0_15] : memref<1x128xf32, #tpu.memory_space<vmem>>, vector<1x128xf32>
    %15 = vector.broadcast %14 : vector<1x128xf32> to vector<24x128xf32>
    %16 = arith.addf %13, %15 : vector<24x128xf32>
    %cst_16 = arith.constant 0.000000e+00 : f32
    %17 = vector.broadcast %cst_16 : f32 to vector<24x128xf32>
    %18 = arith.maximumf %16, %17 : vector<24x128xf32>
    %c0_17 = arith.constant 0 : index
    %c0_18 = arith.constant 0 : index
    %19 = vector.load %arg8[%c0_17, %c0_18] : memref<128x128xf32, #tpu.memory_space<vmem>>, vector<128x128xf32>
    %cst_19 = arith.constant dense<0.000000e+00> : vector<24x128xf32>
    %20 = tpu.matmul %18, %19, %cst_19 {dimension_numbers = #tpu.dot_dimension_numbers<[1], [0], [0], [1], [0, 0, 1, 1], [], []>} : vector<24x128xf32>, vector<128x128xf32>, vector<24x128xf32> -> vector<24x128xf32>
    %c0_20 = arith.constant 0 : index
    %c0_21 = arith.constant 0 : index
    %21 = vector.load %arg9[%c0_20, %c0_21] : memref<1x128xf32, #tpu.memory_space<vmem>>, vector<1x128xf32>
    %22 = vector.broadcast %21 : vector<1x128xf32> to vector<24x128xf32>
    %23 = arith.addf %20, %22 : vector<24x128xf32>
    %24 = arith.negf %23 : vector<24x128xf32>
    %25 = math.exp %24 : vector<24x128xf32>
    %cst_22 = arith.constant 1.000000e+00 : f32
    %26 = vector.broadcast %cst_22 : f32 to vector<24x128xf32>
    %27 = arith.addf %26, %25 : vector<24x128xf32>
    %28 = arith.divf %26, %27 : vector<24x128xf32>
    %c0_23 = arith.constant 0 : index
    %c0_24 = arith.constant 0 : index
    %29 = vector.load %arg10[%c0_23, %c0_24] : memref<24x128xf32, #tpu.memory_space<vmem>>, vector<24x128xf32>
    tpu.vector_store %arg10[%c0_23, %c0_24], %28 {strides = array<i32>} : memref<24x128xf32, #tpu.memory_space<vmem>>, vector<24x128xf32>,
    return
  }
  func.func @transform_0(%arg0: i32) -> (i32, i32) {
    %c0_i32 = arith.constant 0 : i32
    %c0_i32_0 = arith.constant 0 : i32
    return %arg0, %c0_i32 : i32, i32
  }
  func.func @transform_1(%arg0: i32) -> (i32, i32) {
    %c0_i32 = arith.constant 0 : i32
    %c0_i32_0 = arith.constant 0 : i32
    return %arg0, %c0_i32 : i32, i32
  }
  func.func @transform_2(%arg0: i32) -> (i32, i32) {
    %c0_i32 = arith.constant 0 : i32
    %c0_i32_0 = arith.constant 0 : i32
    %c0_i32_1 = arith.constant 0 : i32
    return %c0_i32, %c0_i32_0 : i32, i32
  }
  func.func @transform_3(%arg0: i32) -> (i32, i32) {
    %c0_i32 = arith.constant 0 : i32
    %c0_i32_0 = arith.constant 0 : i32
    %c0_i32_1 = arith.constant 0 : i32
    return %c0_i32, %c0_i32_0 : i32, i32
  }
  func.func @transform_4(%arg0: i32) -> (i32, i32) {
    %c0_i32 = arith.constant 0 : i32
    %c0_i32_0 = arith.constant 0 : i32
    %c0_i32_1 = arith.constant 0 : i32
    return %c0_i32, %c0_i32_0 : i32, i32
  }
  func.func @transform_5(%arg0: i32) -> (i32, i32) {
    %c0_i32 = arith.constant 0 : i32
    %c0_i32_0 = arith.constant 0 : i32
    %c0_i32_1 = arith.constant 0 : i32
    return %c0_i32, %c0_i32_0 : i32, i32
  }
  func.func @transform_6(%arg0: i32) -> (i32, i32) {
    %c0_i32 = arith.constant 0 : i32
    %c0_i32_0 = arith.constant 0 : i32
    %c0_i32_1 = arith.constant 0 : i32
    return %c0_i32, %c0_i32_0 : i32, i32
  }
  func.func @transform_7(%arg0: i32) -> (i32, i32) {
    %c0_i32 = arith.constant 0 : i32
    %c0_i32_0 = arith.constant 0 : i32
    %c0_i32_1 = arith.constant 0 : i32
    return %c0_i32, %c0_i32_0 : i32, i32
  }
  func.func @transform_8(%arg0: i32) -> (i32, i32) {
    %c0_i32 = arith.constant 0 : i32
    %c0_i32_0 = arith.constant 0 : i32
    %c0_i32_1 = arith.constant 0 : i32
    return %c0_i32, %c0_i32_0 : i32, i32
  }
  func.func @transform_9(%arg0: i32) -> (i32, i32) {
    %c0_i32 = arith.constant 0 : i32
    %c0_i32_0 = arith.constant 0 : i32
    return %arg0, %c0_i32 : i32, i32
  }
}

</mosaic_0001>

<bundles_post_ra>
// kernel: tpu_custom_call.1
= control target key start
LH: loop header
LB: loop body
LE: loop exit
PB: predicated region body
PF: predicated region fallthrough
CT: control target
= control target key end

     0   :  { %14 = vsyncpa [#allocation3], 0  ;;  %s719_s0 = inlined_call_operand.hbm [shape: f32[24,128], index: 0, kind: input, shape index: {}]   ;;  %s720_s1 = inlined_call_operand.hbm [shape: f32[24,128], index: 1, kind: input, shape index: {}]   ;;  %s721_s2 = inlined_call_operand.hbm [shape: f32[128,128], index: 2, kind: input, shape index: {}]   ;;  %s722_s3 = inlined_call_operand.hbm [shape: f32[128,128], index: 3, kind: input, shape index: {}]   ;;  %s723_s4 = inlined_call_operand.vmem [shape: f32[1,128], index: 4, kind: input, shape index: {}]   ;;  %s724_s5 = inlined_call_operand.hbm [shape: f32[128,128], index: 5, kind: input, shape index: {}]   ;;  %s725_s6 = inlined_call_operand.vmem [shape: f32[1,128], index: 6, kind: input, shape index: {}]   ;;  %s726_s7 = inlined_call_operand.hbm [shape: f32[128,128], index: 7, kind: input, shape index: {}]   ;;  %s727_s8 = inlined_call_operand.vmem [shape: f32[1,128], index: 8, kind: input, shape index: {}]   ;;  %s728_s9 = inlined_call_operand.hbm [shape: f32[24,128], index: 9, kind: output, shape index: {}]  }
   0x1   :  { %15 = vsyncpa [#allocation6], 0 }
   0x2   :  { %16 = vsyncpa [#allocation9], 0 }
   0x3   :  { %17 = vsyncpa [#allocation12], 0 }
   0x4   :  { %18 = vsyncpa [#allocation4], 0  ;;  %s36_s11 = sshll.u32 %s720_s1, 4  ;;  %s609_s12 = smov [#allocation5]   ;;  %s37_s11 = int_to_ptr.hbm [resolvable:$true] %s36_s11 }
   0x5   :  { %s38_s13 = sshll.u32 %s609_s12, 4  ;;  %s62_s16 = sshll.u32 %s722_s3, 4  ;;  %s39_s13 = int_to_ptr.vmem [resolvable:$true] %s38_s13  ;;  %s63_s16 = int_to_ptr.hbm [resolvable:$true] %s62_s16 }
   0x6   :  { %s610_s17 = smov 128   ;;  %s611_s18 = smov 8  }
   0x7   :  { %44 = dma.hbm_to_vmem [thread:$0]  %s37_s11, 384, %s39_s13, [#allocation6], %s610_s17, %s610_s17, %s611_s18  }
   0x8   :  { %s612_s19 = smov [#allocation8]   ;;  %s23_s1 = sshll.u32 %s719_s0, 4  ;;  %s24_s1 = int_to_ptr.hbm [resolvable:$true] %s23_s1 }
   0x9   :  { %s64_s20 = sshll.u32 %s612_s19, 4  ;;  %s49_s24 = sshll.u32 %s721_s2, 4  ;;  %s65_s20 = int_to_ptr.vmem [resolvable:$true] %s64_s20  ;;  %s50_s24 = int_to_ptr.hbm [resolvable:$true] %s49_s24 }
   0xa   :  { %70 = dma.hbm_to_vmem [thread:$0]  %s63_s16, 2048, %s65_s20, [#allocation9], %s610_s17, %s610_s17, %s611_s18  }
   0xb   :  { %s613_s25 = smov [#allocation2]   ;;  %s614_s27 = smov [#allocation7]  }
   0xc   :  { %s25_s26 = sshll.u32 %s613_s25, 4  ;;  %s51_s0 = sshll.u32 %s614_s27, 4  ;;  %s26_s26 = int_to_ptr.vmem [resolvable:$true] %s25_s26  ;;  %s52_s0 = int_to_ptr.vmem [resolvable:$true] %s51_s0 }
   0xd   :  { %31 = dma.hbm_to_vmem [thread:$0]  %s24_s1, 384, %s26_s26, [#allocation3], %s610_s17, %s610_s17, %s611_s18  }
   0xe   :  { %s77_s30 = sshll.u32 %s724_s5, 4  ;;  %s92_s11 = sshll.u32 %s726_s7, 4  ;;  %s78_s30 = int_to_ptr.hbm [resolvable:$true] %s77_s30  ;;  %s93_s11 = int_to_ptr.hbm [resolvable:$true] %s92_s11 }
   0xf   :  { %57 = dma.hbm_to_vmem [thread:$0]  %s50_s24, 2048, %s52_s0, [#allocation6], %s610_s17, %s610_s17, %s611_s18  }
  0x10   :  { %s615_s12 = smov [#allocation10]   ;;  %s616_s14 = smov [#allocation11]  }
  0x11   :  { %s79_s13 = sshll.u32 %s615_s12, 4  ;;  %s94_s5 = sshll.u32 %s616_s14, 4  ;;  %s80_s13 = int_to_ptr.vmem [resolvable:$true] %s79_s13  ;;  %s95_s5 = int_to_ptr.vmem [resolvable:$true] %s94_s5 }
  0x12   :  { %85 = dma.hbm_to_vmem [thread:$0]  %s78_s30, 2048, %s80_s13, [#allocation9], %s610_s17, %s610_s17, %s611_s18  }
  0x13   :  { %100 = dma.hbm_to_vmem [thread:$0]  %s93_s11, 2048, %s95_s5, [#allocation12], %s610_s17, %s610_s17, %s611_s18  }
  0x14   :  { %599 = dma.done.wait [#allocation3], 384  }
  0x15   :  { %600 = vsyncadd [#allocation3], 4294966912 }
  0x16   :  { %601 = dma.done.wait [#allocation6], 2432  }
  0x17   :  { %602 = vsyncadd [#allocation6], 4294964864 }
  0x18   :  { %603 = dma.done.wait [#allocation9], 4096  }
  0x19   :  { %604 = vsyncadd [#allocation9], 4294963200 }
  0x1a   :  { %605 = dma.done.wait [#allocation12], 2048  }
  0x1b   :  { %606 = vsyncadd [#allocation12], 4294965248  ;;  %v164_v0 = vld [vmem:[#allocation8 + $0x78] sm:$0xff]  ;;  %v163_v2 = vld [vmem:[#allocation8 + $0x70] sm:$0xff]  ;;  %s388_s1 = sshll.u32 %s728_s9, 4  ;;  %s389_s1 = int_to_ptr.hbm [resolvable:$true] %s388_s1 }
  0x1c   :  { %v145_v1 = vld [vmem:[#allocation7 + $0x78] sm:$0xff]  ;;  %165 = vmatpush.msra.mxu0 %v164_v0  ;;  %v144_v3 = vld [vmem:[#allocation7 + $0x70] sm:$0xff]  ;;  %v162_v4 = vld [vmem:[#allocation8 + $0x68] sm:$0xff] }
  0x1d   :  { %191 = vmatpush.msra.mxu1 %v145_v1  ;;  %v143_v5 = vld [vmem:[#allocation7 + $0x68] sm:$0xff]  ;;  %v161_v6 = vld [vmem:[#allocation8 + $0x60] sm:$0xff]  ;;  %v160_v8 = vld [vmem:[#allocation8 + $0x58] sm:$0xff] }
  0x1e   :  { %166 = vmatpush.msra.mxu0 %v163_v2  ;;  %v142_v7 = vld [vmem:[#allocation7 + $0x60] sm:$0xff]  ;;  %v141_v9 = vld [vmem:[#allocation7 + $0x58] sm:$0xff]  ;;  %v159_v10 = vld [vmem:[#allocation8 + $0x50] sm:$0xff] }
  0x1f   :  { %192 = vmatpush.msra.mxu1 %v144_v3  ;;  %v140_v11 = vld [vmem:[#allocation7 + $0x50] sm:$0xff]  ;;  %v158_v12 = vld [vmem:[#allocation8 + $0x48] sm:$0xff]  ;;  %v157_v14 = vld [vmem:[#allocation8 + $0x40] sm:$0xff] }
  0x20   :  { %167 = vmatpush.msra.mxu0 %v162_v4  ;;  %v139_v13 = vld [vmem:[#allocation7 + $0x48] sm:$0xff]  ;;  %v138_v15 = vld [vmem:[#allocation7 + $0x40] sm:$0xff]  ;;  %v156_v16 = vld [vmem:[#allocation8 + $0x38] sm:$0xff] }
  0x21   :  { %193 = vmatpush.msra.mxu1 %v143_v5  ;;  %v137_v17 = vld [vmem:[#allocation7 + $0x38] sm:$0xff]  ;;  %v155_v18 = vld [vmem:[#allocation8 + $0x30] sm:$0xff]  ;;  %v154_v22 = vld [vmem:[#allocation8 + $0x28] sm:$0xff] }
  0x22   :  { %168 = vmatpush.msra.mxu0 %v161_v6  ;;  %v136_v19 = vld [vmem:[#allocation7 + $0x30] sm:$0xff]  ;;  %v242_v20 = vld [vmem:[#allocation10 + $0x78] sm:$0xff]  ;;  %v135_v23 = vld [vmem:[#allocation7 + $0x28] sm:$0xff] }
  0x23   :  { %194 = vmatpush.msra.mxu1 %v142_v7  ;;  %v241_v21 = vld [vmem:[#allocation10 + $0x70] sm:$0xff]  ;;  %247 = vmatpush.msra.mxu2 %v242_v20  ;;  %v240_v24 = vld [vmem:[#allocation10 + $0x68] sm:$0xff]  ;;  %v153_v25 = vld [vmem:[#allocation8 + $0x20] sm:$0xff] }
  0x24   :  { %169 = vmatpush.msra.mxu0 %v160_v8  ;;  %v134_v26 = vld [vmem:[#allocation7 + $0x20] sm:$0xff]  ;;  %v152_v28 = vld [vmem:[#allocation8 + $0x18] sm:$0xff]  ;;  %v151_v31 = vld [vmem:[#allocation8 + $0x10] sm:$0xff] }
  0x25   :  { %195 = vmatpush.msra.mxu1 %v141_v9  ;;  %248 = vmatpush.msra.mxu2 %v241_v21  ;;  %v239_v27 = vld [vmem:[#allocation10 + $0x60] sm:$0xff]  ;;  %v133_v29 = vld [vmem:[#allocation7 + $0x18] sm:$0xff]  ;;  %v132_v32 = vld [vmem:[#allocation7 + $0x10] sm:$0xff] }
  0x26   :  { %170 = vmatpush.msra.mxu0 %v159_v10  ;;  %v238_v30 = vld [vmem:[#allocation10 + $0x58] sm:$0xff]  ;;  %v237_v33 = vld [vmem:[#allocation10 + $0x50] sm:$0xff]  ;;  %v150_v34 = vld [vmem:[#allocation8 + $0x8] sm:$0xff] }
  0x27   :  { %196 = vmatpush.msra.mxu1 %v140_v11  ;;  %249 = vmatpush.msra.mxu2 %v240_v24  ;;  %v131_v35 = vld [vmem:[#allocation7 + $0x8] sm:$0xff]  ;;  %v149_v37 = vld [vmem:[#allocation8] sm:$0xff]  ;;  %v127_v40 = vld [vmem:[#allocation2] sm:$0xff] }
  0x28   :  { %171 = vmatpush.msra.mxu0 %v158_v12  ;;  %v236_v36 = vld [vmem:[#allocation10 + $0x48] sm:$0xff]  ;;  %v130_v38 = vld [vmem:[#allocation7] sm:$0xff]  ;;  %v234_v42 = vld [vmem:[#allocation10 + $0x38] sm:$0xff] }
  0x29   :  { %197 = vmatpush.msra.mxu1 %v139_v13  ;;  %250 = vmatpush.msra.mxu2 %v239_v27  ;;  %v146_v39 = vld [vmem:[#allocation5] sm:$0xff]  ;;  %v235_v41 = vld [vmem:[#allocation10 + $0x40] sm:$0xff]  ;;  %v233_v43 = vld [vmem:[#allocation10 + $0x30] sm:$0xff] }
  0x2a   :  { %172 = vmatpush.msra.mxu0 %v157_v14  ;;  %v232_v44 = vld [vmem:[#allocation10 + $0x28] sm:$0xff]  ;;  %v147_v45 = vld [vmem:[#allocation5 + $0x8] sm:$0xff]  ;;  %v128_v46 = vld [vmem:[#allocation2 + $0x8] sm:$0xff] }
  0x2b   :  { %198 = vmatpush.msra.mxu1 %v138_v15  ;;  %251 = vmatpush.msra.mxu2 %v238_v30  ;;  %v231_v47 = vld [vmem:[#allocation10 + $0x20] sm:$0xff]  ;;  %v148_v48 = vld [vmem:[#allocation5 + $0x10] sm:$0xff]  ;;  %v229_v51 = vld [vmem:[#allocation10 + $0x10] sm:$0xff] }
  0x2c   :  { %173 = vmatpush.msra.mxu0 %v156_v16  ;;  %v129_v49 = vld [vmem:[#allocation2 + $0x10] sm:$0xff]  ;;  %v230_v50 = vld [vmem:[#allocation10 + $0x18] sm:$0xff]  ;;  %v228_v52 = vld [vmem:[#allocation10 + $0x8] sm:$0xff] }
  0x2d   :  { %199 = vmatpush.msra.mxu1 %v137_v17  ;;  %252 = vmatpush.msra.mxu2 %v237_v33  ;;  %v227_v53 = vld [vmem:[#allocation10] sm:$0xff]  ;;  %v291_v54 = vld [vmem:[#allocation11 + $0x78] sm:$0xff]  ;;  %v290_v55 = vld [vmem:[#allocation11 + $0x70] sm:$0xff] }
  0x2e   :  { %174 = vmatpush.msra.mxu0 %v155_v18  ;;  %296 = vmatpush.msra.mxu3 %v291_v54  ;;  %v289_v56 = vld [vmem:[#allocation11 + $0x68] sm:$0xff]  ;;  %v288_v57 = vld [vmem:[#allocation11 + $0x60] sm:$0xff]  ;;  %v287_v58 = vld [vmem:[#allocation11 + $0x58] sm:$0xff] }
  0x2f   :  { %200 = vmatpush.msra.mxu1 %v136_v19  ;;  %253 = vmatpush.msra.mxu2 %v236_v36  ;;  %v416_v59 = vld [vmem:[%s723_s4] ss:$0 sm:$0xff]  ;;  %v285_v0 = vld [vmem:[#allocation11 + $0x48] sm:$0xff]  ;;  %v284_v2 = vld [vmem:[#allocation11 + $0x40] sm:$0xff] }
  0x30   :  { %175 = vmatpush.msra.mxu0 %v154_v22  ;;  %297 = vmatpush.msra.mxu3 %v290_v55  ;;  %v286_v60 = vld [vmem:[#allocation11 + $0x50] sm:$0xff]  ;;  %v283_v4 = vld [vmem:[#allocation11 + $0x38] sm:$0xff]  ;;  %v281_v9 = vld [vmem:[#allocation11 + $0x28] sm:$0xff] }
  0x31   :  { %201 = vmatpush.msra.mxu1 %v135_v23  ;;  %254 = vmatpush.msra.mxu2 %v235_v41  ;;  %v282_v5 = vld [vmem:[#allocation11 + $0x30] sm:$0xff]  ;;  %v280_v11 = vld [vmem:[#allocation11 + $0x20] sm:$0xff]  ;;  %v279_v13 = vld [vmem:[#allocation11 + $0x18] sm:$0xff] }
  0x32   :  { %176 = vmatpush.msra.mxu0 %v153_v25  ;;  %298 = vmatpush.msra.mxu3 %v289_v56  ;;  %v278_v19 = vld [vmem:[#allocation11 + $0x10] sm:$0xff]  ;;  %v277_v20 = vld [vmem:[#allocation11 + $0x8] sm:$0xff]  ;;  %v276_v21 = vld [vmem:[#allocation11] sm:$0xff] }
  0x33   :  { %202 = vmatpush.msra.mxu1 %v134_v26  ;;  %255 = vmatpush.msra.mxu2 %v234_v42  ;;  %v417_v22 = vld [vmem:[%s725_s6] ss:$0 sm:$0xff]  ;;  %s617_s6 = smov [#allocation13]  }
  0x34   :  { %177 = vmatpush.msra.mxu0 %v152_v28  ;;  %299 = vmatpush.msra.mxu3 %v288_v57 }
  0x35   :  { %203 = vmatpush.msra.mxu1 %v133_v29  ;;  %256 = vmatpush.msra.mxu2 %v233_v43 }
  0x36   :  { %178 = vmatpush.msra.mxu0 %v151_v31  ;;  %300 = vmatpush.msra.mxu3 %v287_v58 }
  0x37   :  { %204 = vmatpush.msra.mxu1 %v132_v32  ;;  %257 = vmatpush.msra.mxu2 %v232_v44  ;;  %v418_v32 = vld [vmem:[%s727_s8] ss:$0 sm:$0xff]  ;;  %s386_s8 = sshll.u32 %s617_s6, 4  ;;  %s387_s8 = int_to_ptr.vmem [resolvable:$true] %s386_s8 }
  0x38   :  { %179 = vmatpush.msra.mxu0 %v150_v34  ;;  %301 = vmatpush.msra.mxu3 %v286_v60 }
  0x39   :  { %205 = vmatpush.msra.mxu1 %v131_v35  ;;  %258 = vmatpush.msra.mxu2 %v231_v47 }
  0x3a   :  { %180 = vmatpush.msra.mxu0 %v149_v37  ;;  %302 = vmatpush.msra.mxu3 %v285_v0 }
  0x3b   :  { %206 = vmatpush.msra.mxu1 %v130_v38  ;;  %181 = vmatmul.f32.vlgmr.msra.gmra.mxu0 %v146_v39 }
  0x3c   :  { %207 = vmatmul.f32.vlgmr.msra.gmra.mxu1 %v127_v40  ;;  %259 = vmatpush.msra.mxu2 %v230_v50 }
  0x3d   :  { %303 = vmatpush.msra.mxu3 %v284_v2 }
  0x3e   :  { %260 = vmatpush.msra.mxu2 %v229_v51 }
  0x3f   :  { %304 = vmatpush.msra.mxu3 %v283_v4 }
  0x40   :  { %261 = vmatpush.msra.mxu2 %v228_v52 }
  0x41   :  { %305 = vmatpush.msra.mxu3 %v282_v5 }
  0x42   :  { %262 = vmatpush.msra.mxu2 %v227_v53 }
  0x43   :  { %184 = vmatmul.f32.gmra.mxu0 %v147_v45  ;;  %306 = vmatpush.msra.mxu3 %v281_v9 }
  0x44   :  { %210 = vmatmul.f32.gmra.mxu1 %v128_v46 }
  0x45   :  { %307 = vmatpush.msra.mxu3 %v280_v11 }
  0x47   :  { %308 = vmatpush.msra.mxu3 %v279_v13 }
  0x49   :  { %309 = vmatpush.msra.mxu3 %v278_v19 }
  0x4b   :  { %187 = vmatmul.f32.gmra.mxu0 %v148_v48  ;;  %310 = vmatpush.msra.mxu3 %v277_v20 }
  0x4c   :  { %213 = vmatmul.f32.gmra.mxu1 %v129_v49 }
  0x4d   :  { %311 = vmatpush.msra.mxu3 %v276_v21 }
  0xb8   :  { %v182_v61 = vpop.f32.mrf.mxu0 }
  0xb9   :  { %v208_v62 = vpop.f32.mrf.mxu1 }
  0xba   :  { %v209_v63 = vadd.f32 %v208_v62, %v182_v61 }
  0xbc   :  { %v221_v1 = vadd.f32 %v416_v59, %v209_v63 }
  0xbe   :  { %v224_v3 = vmax.f32 %v221_v1, 0.0 }
  0xc0   :  { %263 = vmatmul.f32.vlgmr.msra.gmra.mxu2 %v224_v3  ;;  %v185_v6 = vpop.f32.mrf.mxu0 }
  0xc1   :  { %v211_v7 = vpop.f32.mrf.mxu1 }
  0xc2   :  { %v212_v8 = vadd.f32 %v211_v7, %v185_v6 }
  0xc4   :  { %v222_v10 = vadd.f32 %v416_v59, %v212_v8 }
  0xc6   :  { %v225_v12 = vmax.f32 %v222_v10, 0.0 }
  0xc8   :  { %266 = vmatmul.f32.gmra.mxu2 %v225_v12  ;;  %v188_v14 = vpop.f32.mrf.mxu0 }
  0xc9   :  { %v214_v15 = vpop.f32.mrf.mxu1 }
  0xca   :  { %v215_v16 = vadd.f32 %v214_v15, %v188_v14 }
  0xcc   :  { %v223_v17 = vadd.f32 %v416_v59, %v215_v16 }
  0xce   :  { %v226_v18 = vmax.f32 %v223_v17, 0.0 }
  0xd0   :  { %269 = vmatmul.f32.gmra.mxu2 %v226_v18 }
 0x143   :  { %v264_v23 = vpop.f32.mrf.mxu2 }
 0x144   :  { %v265_v24 = vadd.f32 %v417_v22, %v264_v23 }
 0x146   :  { %v273_v25 = vmax.f32 %v265_v24, 0.0 }
 0x148   :  { %312 = vmatmul.f32.vlgmr.msra.gmra.mxu3 %v273_v25 }
 0x14b   :  { %v267_v26 = vpop.f32.mrf.mxu2 }
 0x14c   :  { %v268_v27 = vadd.f32 %v417_v22, %v267_v26 }
 0x14e   :  { %v274_v28 = vmax.f32 %v268_v27, 0.0 }
 0x150   :  { %315 = vmatmul.f32.gmra.mxu3 %v274_v28 }
 0x153   :  { %v270_v29 = vpop.f32.mrf.mxu2 }
 0x154   :  { %v271_v30 = vadd.f32 %v417_v22, %v270_v29 }
 0x156   :  { %v275_v31 = vmax.f32 %v271_v30, 0.0 }
 0x158   :  { %318 = vmatmul.f32.gmra.mxu3 %v275_v31 }
 0x1cb   :  { %v313_v33 = vpop.f32.mrf.mxu3 }
 0x1cc   :  { %v314_v34 = vadd.f32 %v418_v32, %v313_v33 }
 0x1ce   :  { %v404_v35 = vmul.f32 -1.442695, %v314_v34 }
 0x1d0   :  { %419 = vpow2.f32 %v404_v35 }
 0x1d3   :  { %v316_v36 = vpop.f32.mrf.mxu3 }
 0x1d4   :  { %v317_v37 = vadd.f32 %v418_v32, %v316_v36 }
 0x1d6   :  { %v420_v38 = vpop.eup %419  ;;  %v405_v39 = vmul.f32 -1.442695, %v317_v37 }
 0x1d7   :  { %v331_v40 = vadd.f32 1.0, %v420_v38 }
 0x1d8   :  { %421 = vpow2.f32 %v405_v39 }
 0x1d9   :  { %423 = vrcp.f32 %v331_v40  ;;  %v345_v49 = vand.u32 2147483648, %v331_v40  ;;  %v343_v51 = vand.u32 2147483647, %v331_v40  ;;  %vm339_vm1 = vweird.f32 %v331_v40 }
 0x1db   :  { %v319_v41 = vpop.f32.mrf.mxu3  ;;  %v346_v56 = vor.u32 1.1754944e-38, %v345_v49  ;;  %vm344_vm3 = vcmp.eq.f32.partialorder %v343_v51, 8.507059e+37 }
 0x1dc   :  { %v320_v42 = vadd.f32 %v418_v32, %v319_v41 }
 0x1de   :  { %v422_v43 = vpop.eup %421  ;;  %v406_v44 = vmul.f32 -1.442695, %v320_v42 }
 0x1df   :  { %v424_v45 = vpop.eup %423  ;;  %v332_v46 = vadd.f32 1.0, %v422_v43 }
 0x1e0   :  { %v335_v47 = vmul.f32 %v424_v45, %v331_v40  ;;  %425 = vpow2.f32 %v406_v44  ;;  %vm340_vm0 = vweird.f32 %v424_v45 }
 0x1e1   :  { %427 = vrcp.f32 %v332_v46  ;;  %vm341_vm2 = vmor %vm339_vm1, %vm340_vm0  ;;  %v360_v61 = vand.u32 2147483648, %v332_v46  ;;  %v358_v63 = vand.u32 2147483647, %v332_v46  ;;  %vm354_vm5 = vweird.f32 %v332_v46 }
 0x1e2   :  { %v336_v48 = vsub.f32 1.0, %v335_v47 }
 0x1e3   :  { %v361_v2 = vor.u32 1.1754944e-38, %v360_v61  ;;  %vm359_vm7 = vcmp.eq.f32.partialorder %v358_v63, 8.507059e+37 }
 0x1e4   :  { %v337_v50 = vmul.f32 %v424_v45, %v336_v48 }
 0x1e6   :  { %v426_v52 = vpop.eup %425  ;;  %v338_v53 = vadd.f32 %v424_v45, %v337_v50 }
 0x1e7   :  { %v428_v54 = vpop.eup %427  ;;  %v333_v55 = vadd.f32 1.0, %v426_v52 }
 0x1e8   :  { %v350_v57 = vmul.f32 %v428_v54, %v332_v46  ;;  %v342_v58 = vsel %vm341_vm2, %v424_v45, %v338_v53  ;;  %vm355_vm4 = vweird.f32 %v428_v54 }
 0x1e9   :  { %429 = vrcp.f32 %v333_v55  ;;  %v347_v59 = vsel %vm344_vm3, %v346_v56, %v342_v58  ;;  %vm356_vm6 = vmor %vm354_vm5, %vm355_vm4  ;;  %v375_v7 = vand.u32 2147483648, %v333_v55  ;;  %v373_v9 = vand.u32 2147483647, %v333_v55 }
 0x1ea   :  { %v351_v60 = vsub.f32 1.0, %v350_v57  ;;  %379 = vst [vmem:[#allocation13] sm:$0xff] %v347_v59  ;;  %vm369_vm9 = vweird.f32 %v333_v55 }
 0x1eb   :  { %v376_v11 = vor.u32 1.1754944e-38, %v375_v7  ;;  %vm374_vm11 = vcmp.eq.f32.partialorder %v373_v9, 8.507059e+37 }
 0x1ec   :  { %v352_v62 = vmul.f32 %v428_v54, %v351_v60 }
 0x1ee   :  { %v353_v0 = vadd.f32 %v428_v54, %v352_v62 }
 0x1ef   :  { %v430_v1 = vpop.eup %429 }
 0x1f0   :  { %v365_v3 = vmul.f32 %v430_v1, %v333_v55  ;;  %v357_v4 = vsel %vm356_vm6, %v428_v54, %v353_v0  ;;  %vm370_vm8 = vweird.f32 %v430_v1 }
 0x1f1   :  { %v362_v5 = vsel %vm359_vm7, %v361_v2, %v357_v4  ;;  %vm371_vm10 = vmor %vm369_vm9, %vm370_vm8 }
 0x1f2   :  { %v366_v6 = vsub.f32 1.0, %v365_v3  ;;  %380 = vst [vmem:[#allocation13 + $0x8] sm:$0xff] %v362_v5 }
 0x1f4   :  { %v367_v8 = vmul.f32 %v430_v1, %v366_v6 }
 0x1f6   :  { %v368_v10 = vadd.f32 %v430_v1, %v367_v8 }
 0x1f8   :  { %v372_v12 = vsel %vm371_vm10, %v430_v1, %v368_v10 }
 0x1f9   :  { %v377_v13 = vsel %vm374_vm11, %v376_v11, %v372_v12 }
 0x1fa   :  { %381 = vst [vmem:[#allocation13 + $0x10] sm:$0xff] %v377_v13 }
 0x1fb   :  { %394 = dma.vmem_to_hbm [thread:$0]  %s387_s8, 384, %s389_s1, [#allocation4], %s610_s17, %s610_s17, %s611_s18  }
 0x1fc   :  { %607 = dma.done.wait [#allocation4], 384  }
 0x1fd   :  { %608 = vsyncadd [#allocation4], 4294966912 }
 0x1fe   :  { %399 = vsyncpa [#allocation3], 1 }
 0x1ff   :  { %400 = vsyncpa [#allocation6], 1 }
 0x200   :  { %401 = vsyncpa [#allocation9], 1 }
 0x201   :  { %402 = vsyncpa [#allocation12], 1 }
 0x202   :  { %403 = vsyncpa [#allocation4], 1 }

// kernel: tpu_custom_call.1
= control target key start
LH: loop header
LB: loop body
LE: loop exit
PB: predicated region body
PF: predicated region fallthrough
CT: control target
= control target key end

     0   :  { %14 = vsyncpa [#allocation3], 0  ;;  %s719_s0 = inlined_call_operand.hbm [shape: f32[24,128], index: 0, kind: input, shape index: {}]   ;;  %s720_s1 = inlined_call_operand.hbm [shape: f32[24,128], index: 1, kind: input, shape index: {}]   ;;  %s721_s2 = inlined_call_operand.hbm [shape: f32[128,128], index: 2, kind: input, shape index: {}]   ;;  %s722_s3 = inlined_call_operand.hbm [shape: f32[128,128], index: 3, kind: input, shape index: {}]   ;;  %s723_s4 = inlined_call_operand.vmem [shape: f32[1,128], index: 4, kind: input, shape index: {}]   ;;  %s724_s5 = inlined_call_operand.hbm [shape: f32[128,128], index: 5, kind: input, shape index: {}]   ;;  %s725_s6 = inlined_call_operand.vmem [shape: f32[1,128], index: 6, kind: input, shape index: {}]   ;;  %s726_s7 = inlined_call_operand.hbm [shape: f32[128,128], index: 7, kind: input, shape index: {}]   ;;  %s727_s8 = inlined_call_operand.vmem [shape: f32[1,128], index: 8, kind: input, shape index: {}]   ;;  %s728_s9 = inlined_call_operand.hbm [shape: f32[24,128], index: 9, kind: output, shape index: {}]  }
   0x1   :  { %15 = vsyncpa [#allocation6], 0 }
   0x2   :  { %16 = vsyncpa [#allocation9], 0 }
   0x3   :  { %17 = vsyncpa [#allocation12], 0 }
   0x4   :  { %18 = vsyncpa [#allocation4], 0  ;;  %s36_s11 = sshll.u32 %s720_s1, 4  ;;  %s609_s12 = smov [#allocation5]   ;;  %s37_s11 = int_to_ptr.hbm [resolvable:$true] %s36_s11 }
   0x5   :  { %s38_s13 = sshll.u32 %s609_s12, 4  ;;  %s62_s16 = sshll.u32 %s722_s3, 4  ;;  %s39_s13 = int_to_ptr.vmem [resolvable:$true] %s38_s13  ;;  %s63_s16 = int_to_ptr.hbm [resolvable:$true] %s62_s16 }
   0x6   :  { %s610_s17 = smov 128   ;;  %s611_s18 = smov 8  }
   0x7   :  { %44 = dma.hbm_to_vmem [thread:$0]  %s37_s11, 384, %s39_s13, [#allocation6], %s610_s17, %s610_s17, %s611_s18  }
   0x8   :  { %s612_s19 = smov [#allocation8]   ;;  %s23_s1 = sshll.u32 %s719_s0, 4  ;;  %s24_s1 = int_to_ptr.hbm [resolvable:$true] %s23_s1 }
   0x9   :  { %s64_s20 = sshll.u32 %s612_s19, 4  ;;  %s49_s24 = sshll.u32 %s721_s2, 4  ;;  %s65_s20 = int_to_ptr.vmem [resolvable:$true] %s64_s20  ;;  %s50_s24 = int_to_ptr.hbm [resolvable:$true] %s49_s24 }
   0xa   :  { %70 = dma.hbm_to_vmem [thread:$0]  %s63_s16, 2048, %s65_s20, [#allocation9], %s610_s17, %s610_s17, %s611_s18  }
   0xb   :  { %s613_s25 = smov [#allocation2]   ;;  %s614_s27 = smov [#allocation7]  }
   0xc   :  { %s25_s26 = sshll.u32 %s613_s25, 4  ;;  %s51_s0 = sshll.u32 %s614_s27, 4  ;;  %s26_s26 = int_to_ptr.vmem [resolvable:$true] %s25_s26  ;;  %s52_s0 = int_to_ptr.vmem [resolvable:$true] %s51_s0 }
   0xd   :  { %31 = dma.hbm_to_vmem [thread:$0]  %s24_s1, 384, %s26_s26, [#allocation3], %s610_s17, %s610_s17, %s611_s18  }
   0xe   :  { %s77_s30 = sshll.u32 %s724_s5, 4  ;;  %s92_s11 = sshll.u32 %s726_s7, 4  ;;  %s78_s30 = int_to_ptr.hbm [resolvable:$true] %s77_s30  ;;  %s93_s11 = int_to_ptr.hbm [resolvable:$true] %s92_s11 }
   0xf   :  { %57 = dma.hbm_to_vmem [thread:$0]  %s50_s24, 2048, %s52_s0, [#allocation6], %s610_s17, %s610_s17, %s611_s18  }
  0x10   :  { %s615_s12 = smov [#allocation10]   ;;  %s616_s14 = smov [#allocation11]  }
  0x11   :  { %s79_s13 = sshll.u32 %s615_s12, 4  ;;  %s94_s5 = sshll.u32 %s616_s14, 4  ;;  %s80_s13 = int_to_ptr.vmem [resolvable:$true] %s79_s13  ;;  %s95_s5 = int_to_ptr.vmem [resolvable:$true] %s94_s5 }
  0x12   :  { %85 = dma.hbm_to_vmem [thread:$0]  %s78_s30, 2048, %s80_s13, [#allocation9], %s610_s17, %s610_s17, %s611_s18  }
  0x13   :  { %100 = dma.hbm_to_vmem [thread:$0]  %s93_s11, 2048, %s95_s5, [#allocation12], %s610_s17, %s610_s17, %s611_s18  }
  0x14   :  { %599 = dma.done.wait [#allocation3], 384  }
  0x15   :  { %600 = vsyncadd [#allocation3], 4294966912 }
  0x16   :  { %601 = dma.done.wait [#allocation6], 2432  }
  0x17   :  { %602 = vsyncadd [#allocation6], 4294964864 }
  0x18   :  { %603 = dma.done.wait [#allocation9], 4096  }
  0x19   :  { %604 = vsyncadd [#allocation9], 4294963200 }
  0x1a   :  { %605 = dma.done.wait [#allocation12], 2048  }
  0x1b   :  { %606 = vsyncadd [#allocation12], 4294965248  ;;  %v164_v0 = vld [vmem:[#allocation8 + $0x78] sm:$0xff]  ;;  %v163_v2 = vld [vmem:[#allocation8 + $0x70] sm:$0xff]  ;;  %s388_s1 = sshll.u32 %s728_s9, 4  ;;  %s389_s1 = int_to_ptr.hbm [resolvable:$true] %s388_s1 }
  0x1c   :  { %v145_v1 = vld [vmem:[#allocation7 + $0x78] sm:$0xff]  ;;  %165 = vmatpush.msra.mxu0 %v164_v0  ;;  %v144_v3 = vld [vmem:[#allocation7 + $0x70] sm:$0xff]  ;;  %v162_v4 = vld [vmem:[#allocation8 + $0x68] sm:$0xff] }
  0x1d   :  { %191 = vmatpush.msra.mxu1 %v145_v1  ;;  %v143_v5 = vld [vmem:[#allocation7 + $0x68] sm:$0xff]  ;;  %v161_v6 = vld [vmem:[#allocation8 + $0x60] sm:$0xff]  ;;  %v160_v8 = vld [vmem:[#allocation8 + $0x58] sm:$0xff] }
  0x1e   :  { %166 = vmatpush.msra.mxu0 %v163_v2  ;;  %v142_v7 = vld [vmem:[#allocation7 + $0x60] sm:$0xff]  ;;  %v141_v9 = vld [vmem:[#allocation7 + $0x58] sm:$0xff]  ;;  %v159_v10 = vld [vmem:[#allocation8 + $0x50] sm:$0xff] }
  0x1f   :  { %192 = vmatpush.msra.mxu1 %v144_v3  ;;  %v140_v11 = vld [vmem:[#allocation7 + $0x50] sm:$0xff]  ;;  %v158_v12 = vld [vmem:[#allocation8 + $0x48] sm:$0xff]  ;;  %v157_v14 = vld [vmem:[#allocation8 + $0x40] sm:$0xff] }
  0x20   :  { %167 = vmatpush.msra.mxu0 %v162_v4  ;;  %v139_v13 = vld [vmem:[#allocation7 + $0x48] sm:$0xff]  ;;  %v138_v15 = vld [vmem:[#allocation7 + $0x40] sm:$0xff]  ;;  %v156_v16 = vld [vmem:[#allocation8 + $0x38] sm:$0xff] }
  0x21   :  { %193 = vmatpush.msra.mxu1 %v143_v5  ;;  %v137_v17 = vld [vmem:[#allocation7 + $0x38] sm:$0xff]  ;;  %v155_v18 = vld [vmem:[#allocation8 + $0x30] sm:$0xff]  ;;  %v154_v22 = vld [vmem:[#allocation8 + $0x28] sm:$0xff] }
  0x22   :  { %168 = vmatpush.msra.mxu0 %v161_v6  ;;  %v136_v19 = vld [vmem:[#allocation7 + $0x30] sm:$0xff]  ;;  %v242_v20 = vld [vmem:[#allocation10 + $0x78] sm:$0xff]  ;;  %v135_v23 = vld [vmem:[#allocation7 + $0x28] sm:$0xff] }
  0x23   :  { %194 = vmatpush.msra.mxu1 %v142_v7  ;;  %v241_v21 = vld [vmem:[#allocation10 + $0x70] sm:$0xff]  ;;  %247 = vmatpush.msra.mxu2 %v242_v20  ;;  %v240_v24 = vld [vmem:[#allocation10 + $0x68] sm:$0xff]  ;;  %v153_v25 = vld [vmem:[#allocation8 + $0x20] sm:$0xff] }
  0x24   :  { %169 = vmatpush.msra.mxu0 %v160_v8  ;;  %v134_v26 = vld [vmem:[#allocation7 + $0x20] sm:$0xff]  ;;  %v152_v28 = vld [vmem:[#allocation8 + $0x18] sm:$0xff]  ;;  %v151_v31 = vld [vmem:[#allocation8 + $0x10] sm:$0xff] }
  0x25   :  { %195 = vmatpush.msra.mxu1 %v141_v9  ;;  %248 = vmatpush.msra.mxu2 %v241_v21  ;;  %v239_v27 = vld [vmem:[#allocation10 + $0x60] sm:$0xff]  ;;  %v133_v29 = vld [vmem:[#allocation7 + $0x18] sm:$0xff]  ;;  %v132_v32 = vld [vmem:[#allocation7 + $0x10] sm:$0xff] }
  0x26   :  { %170 = vmatpush.msra.mxu0 %v159_v10  ;;  %v238_v30 = vld [vmem:[#allocation10 + $0x58] sm:$0xff]  ;;  %v237_v33 = vld [vmem:[#allocation10 + $0x50] sm:$0xff]  ;;  %v150_v34 = vld [vmem:[#allocation8 + $0x8] sm:$0xff] }
  0x27   :  { %196 = vmatpush.msra.mxu1 %v140_v11  ;;  %249 = vmatpush.msra.mxu2 %v240_v24  ;;  %v131_v35 = vld [vmem:[#allocation7 + $0x8] sm:$0xff]  ;;  %v149_v37 = vld [vmem:[#allocation8] sm:$0xff]  ;;  %v127_v40 = vld [vmem:[#allocation2] sm:$0xff] }
  0x28   :  { %171 = vmatpush.msra.mxu0 %v158_v12  ;;  %v236_v36 = vld [vmem:[#allocation10 + $0x48] sm:$0xff]  ;;  %v130_v38 = vld [vmem:[#allocation7] sm:$0xff]  ;;  %v234_v42 = vld [vmem:[#allocation10 + $0x38] sm:$0xff] }
  0x29   :  { %197 = vmatpush.msra.mxu1 %v139_v13  ;;  %250 = vmatpush.msra.mxu2 %v239_v27  ;;  %v146_v39 = vld [vmem:[#allocation5] sm:$0xff]  ;;  %v235_v41 = vld [vmem:[#allocation10 + $0x40] sm:$0xff]  ;;  %v233_v43 = vld [vmem:[#allocation10 + $0x30] sm:$0xff] }
  0x2a   :  { %172 = vmatpush.msra.mxu0 %v157_v14  ;;  %v232_v44 = vld [vmem:[#allocation10 + $0x28] sm:$0xff]  ;;  %v147_v45 = vld [vmem:[#allocation5 + $0x8] sm:$0xff]  ;;  %v128_v46 = vld [vmem:[#allocation2 + $0x8] sm:$0xff] }
  0x2b   :  { %198 = vmatpush.msra.mxu1 %v138_v15  ;;  %251 = vmatpush.msra.mxu2 %v238_v30  ;;  %v231_v47 = vld [vmem:[#allocation10 + $0x20] sm:$0xff]  ;;  %v148_v48 = vld [vmem:[#allocation5 + $0x10] sm:$0xff]  ;;  %v229_v51 = vld [vmem:[#allocation10 + $0x10] sm:$0xff] }
  0x2c   :  { %173 = vmatpush.msra.mxu0 %v156_v16  ;;  %v129_v49 = vld [vmem:[#allocation2 + $0x10] sm:$0xff]  ;;  %v230_v50 = vld [vmem:[#allocation10 + $0x18] sm:$0xff]  ;;  %v228_v52 = vld [vmem:[#allocation10 + $0x8] sm:$0xff] }
  0x2d   :  { %199 = vmatpush.msra.mxu1 %v137_v17  ;;  %252 = vmatpush.msra.mxu2 %v237_v33  ;;  %v227_v53 = vld [vmem:[#allocation10] sm:$0xff]  ;;  %v291_v54 = vld [vmem:[#allocation11 + $0x78] sm:$0xff]  ;;  %v290_v55 = vld [vmem:[#allocation11 + $0x70] sm:$0xff] }
  0x2e   :  { %174 = vmatpush.msra.mxu0 %v155_v18  ;;  %296 = vmatpush.msra.mxu3 %v291_v54  ;;  %v289_v56 = vld [vmem:[#allocation11 + $0x68] sm:$0xff]  ;;  %v288_v57 = vld [vmem:[#allocation11 + $0x60] sm:$0xff]  ;;  %v287_v58 = vld [vmem:[#allocation11 + $0x58] sm:$0xff] }
  0x2f   :  { %200 = vmatpush.msra.mxu1 %v136_v19  ;;  %253 = vmatpush.msra.mxu2 %v236_v36  ;;  %v416_v59 = vld [vmem:[%s723_s4] ss:$0 sm:$0xff]  ;;  %v285_v0 = vld [vmem:[#allocation11 + $0x48] sm:$0xff]  ;;  %v284_v2 = vld [vmem:[#allocation11 + $0x40] sm:$0xff] }
  0x30   :  { %175 = vmatpush.msra.mxu0 %v154_v22  ;;  %297 = vmatpush.msra.mxu3 %v290_v55  ;;  %v286_v60 = vld [vmem:[#allocation11 + $0x50] sm:$0xff]  ;;  %v283_v4 = vld [vmem:[#allocation11 + $0x38] sm:$0xff]  ;;  %v281_v9 = vld [vmem:[#allocation11 + $0x28] sm:$0xff] }
  0x31   :  { %201 = vmatpush.msra.mxu1 %v135_v23  ;;  %254 = vmatpush.msra.mxu2 %v235_v41  ;;  %v282_v5 = vld [vmem:[#allocation11 + $0x30] sm:$0xff]  ;;  %v280_v11 = vld [vmem:[#allocation11 + $0x20] sm:$0xff]  ;;  %v279_v13 = vld [vmem:[#allocation11 + $0x18] sm:$0xff] }
  0x32   :  { %176 = vmatpush.msra.mxu0 %v153_v25  ;;  %298 = vmatpush.msra.mxu3 %v289_v56  ;;  %v278_v19 = vld [vmem:[#allocation11 + $0x10] sm:$0xff]  ;;  %v277_v20 = vld [vmem:[#allocation11 + $0x8] sm:$0xff]  ;;  %v276_v21 = vld [vmem:[#allocation11] sm:$0xff] }
  0x33   :  { %202 = vmatpush.msra.mxu1 %v134_v26  ;;  %255 = vmatpush.msra.mxu2 %v234_v42  ;;  %v417_v22 = vld [vmem:[%s725_s6] ss:$0 sm:$0xff]  ;;  %s617_s6 = smov [#allocation13]  }
  0x34   :  { %177 = vmatpush.msra.mxu0 %v152_v28  ;;  %299 = vmatpush.msra.mxu3 %v288_v57 }
  0x35   :  { %203 = vmatpush.msra.mxu1 %v133_v29  ;;  %256 = vmatpush.msra.mxu2 %v233_v43 }
  0x36   :  { %178 = vmatpush.msra.mxu0 %v151_v31  ;;  %300 = vmatpush.msra.mxu3 %v287_v58 }
  0x37   :  { %204 = vmatpush.msra.mxu1 %v132_v32  ;;  %257 = vmatpush.msra.mxu2 %v232_v44  ;;  %v418_v32 = vld [vmem:[%s727_s8] ss:$0 sm:$0xff]  ;;  %s386_s8 = sshll.u32 %s617_s6, 4  ;;  %s387_s8 = int_to_ptr.vmem [resolvable:$true] %s386_s8 }
  0x38   :  { %179 = vmatpush.msra.mxu0 %v150_v34  ;;  %301 = vmatpush.msra.mxu3 %v286_v60 }
  0x39   :  { %205 = vmatpush.msra.mxu1 %v131_v35  ;;  %258 = vmatpush.msra.mxu2 %v231_v47 }
  0x3a   :  { %180 = vmatpush.msra.mxu0 %v149_v37  ;;  %302 = vmatpush.msra.mxu3 %v285_v0 }
  0x3b   :  { %206 = vmatpush.msra.mxu1 %v130_v38  ;;  %181 = vmatmul.f32.vlgmr.msra.gmra.mxu0 %v146_v39 }
  0x3c   :  { %207 = vmatmul.f32.vlgmr.msra.gmra.mxu1 %v127_v40  ;;  %259 = vmatpush.msra.mxu2 %v230_v50 }
  0x3d   :  { %303 = vmatpush.msra.mxu3 %v284_v2 }
  0x3e   :  { %260 = vmatpush.msra.mxu2 %v229_v51 }
  0x3f   :  { %304 = vmatpush.msra.mxu3 %v283_v4 }
  0x40   :  { %261 = vmatpush.msra.mxu2 %v228_v52 }
  0x41   :  { %305 = vmatpush.msra.mxu3 %v282_v5 }
  0x42   :  { %262 = vmatpush.msra.mxu2 %v227_v53 }
  0x43   :  { %184 = vmatmul.f32.gmra.mxu0 %v147_v45  ;;  %306 = vmatpush.msra.mxu3 %v281_v9 }
  0x44   :  { %210 = vmatmul.f32.gmra.mxu1 %v128_v46 }
  0x45   :  { %307 = vmatpush.msra.mxu3 %v280_v11 }
  0x47   :  { %308 = vmatpush.msra.mxu3 %v279_v13 }
  0x49   :  { %309 = vmatpush.msra.mxu3 %v278_v19 }
  0x4b   :  { %187 = vmatmul.f32.gmra.mxu0 %v148_v48  ;;  %310 = vmatpush.msra.mxu3 %v277_v20 }
  0x4c   :  { %213 = vmatmul.f32.gmra.mxu1 %v129_v49 }
  0x4d   :  { %311 = vmatpush.msra.mxu3 %v276_v21 }
  0xb8   :  { %v182_v61 = vpop.f32.mrf.mxu0 }
  0xb9   :  { %v208_v62 = vpop.f32.mrf.mxu1 }
  0xba   :  { %v209_v63 = vadd.f32 %v208_v62, %v182_v61 }
  0xbc   :  { %v221_v1 = vadd.f32 %v416_v59, %v209_v63 }
  0xbe   :  { %v224_v3 = vmax.f32 %v221_v1, 0.0 }
  0xc0   :  { %263 = vmatmul.f32.vlgmr.msra.gmra.mxu2 %v224_v3  ;;  %v185_v6 = vpop.f32.mrf.mxu0 }
  0xc1   :  { %v211_v7 = vpop.f32.mrf.mxu1 }
  0xc2   :  { %v212_v8 = vadd.f32 %v211_v7, %v185_v6 }
  0xc4   :  { %v222_v10 = vadd.f32 %v416_v59, %v212_v8 }
  0xc6   :  { %v225_v12 = vmax.f32 %v222_v10, 0.0 }
  0xc8   :  { %266 = vmatmul.f32.gmra.mxu2 %v225_v12  ;;  %v188_v14 = vpop.f32.mrf.mxu0 }
  0xc9   :  { %v214_v15 = vpop.f32.mrf.mxu1 }
  0xca   :  { %v215_v16 = vadd.f32 %v214_v15, %v188_v14 }
  0xcc   :  { %v223_v17 = vadd.f32 %v416_v59, %v215_v16 }
  0xce   :  { %v226_v18 = vmax.f32 %v223_v17, 0.0 }
  0xd0   :  { %269 = vmatmul.f32.gmra.mxu2 %v226_v18 }
 0x143   :  { %v264_v23 = vpop.f32.mrf.mxu2 }
 0x144   :  { %v265_v24 = vadd.f32 %v417_v22, %v264_v23 }
 0x146   :  { %v273_v25 = vmax.f32 %v265_v24, 0.0 }
 0x148   :  { %312 = vmatmul.f32.vlgmr.msra.gmra.mxu3 %v273_v25 }
 0x14b   :  { %v267_v26 = vpop.f32.mrf.mxu2 }
 0x14c   :  { %v268_v27 = vadd.f32 %v417_v22, %v267_v26 }
 0x14e   :  { %v274_v28 = vmax.f32 %v268_v27, 0.0 }
 0x150   :  { %315 = vmatmul.f32.gmra.mxu3 %v274_v28 }
 0x153   :  { %v270_v29 = vpop.f32.mrf.mxu2 }
 0x154   :  { %v271_v30 = vadd.f32 %v417_v22, %v270_v29 }
 0x156   :  { %v275_v31 = vmax.f32 %v271_v30, 0.0 }
 0x158   :  { %318 = vmatmul.f32.gmra.mxu3 %v275_v31 }
 0x1cb   :  { %v313_v33 = vpop.f32.mrf.mxu3 }
 0x1cc   :  { %v314_v34 = vadd.f32 %v418_v32, %v313_v33 }
 0x1ce   :  { %v404_v35 = vmul.f32 -1.442695, %v314_v34 }
 0x1d0   :  { %419 = vpow2.f32 %v404_v35 }
 0x1d3   :  { %v316_v36 = vpop.f32.mrf.mxu3 }
 0x1d4   :  { %v317_v37 = vadd.f32 %v418_v32, %v316_v36 }
 0x1d6   :  { %v420_v38 = vpop.eup %419  ;;  %v405_v39 = vmul.f32 -1.442695, %v317_v37 }
 0x1d7   :  { %v331_v40 = vadd.f32 1.0, %v420_v38 }
 0x1d8   :  { %421 = vpow2.f32 %v405_v39 }
 0x1d9   :  { %423 = vrcp.f32 %v331_v40  ;;  %v345_v49 = vand.u32 2147483648, %v331_v40  ;;  %v343_v51 = vand.u32 2147483647, %v331_v40  ;;  %vm339_vm1 = vweird.f32 %v331_v40 }
 0x1db   :  { %v319_v41 = vpop.f32.mrf.mxu3  ;;  %v346_v56 = vor.u32 1.1754944e-38, %v345_v49  ;;  %vm344_vm3 = vcmp.eq.f32.partialorder %v343_v51, 8.507059e+37 }
 0x1dc   :  { %v320_v42 = vadd.f32 %v418_v32, %v319_v41 }
 0x1de   :  { %v422_v43 = vpop.eup %421  ;;  %v406_v44 = vmul.f32 -1.442695, %v320_v42 }
 0x1df   :  { %v424_v45 = vpop.eup %423  ;;  %v332_v46 = vadd.f32 1.0, %v422_v43 }
 0x1e0   :  { %v335_v47 = vmul.f32 %v424_v45, %v331_v40  ;;  %425 = vpow2.f32 %v406_v44  ;;  %vm340_vm0 = vweird.f32 %v424_v45 }
 0x1e1   :  { %427 = vrcp.f32 %v332_v46  ;;  %vm341_vm2 = vmor %vm339_vm1, %vm340_vm0  ;;  %v360_v61 = vand.u32 2147483648, %v332_v46  ;;  %v358_v63 = vand.u32 2147483647, %v332_v46  ;;  %vm354_vm5 = vweird.f32 %v332_v46 }
 0x1e2   :  { %v336_v48 = vsub.f32 1.0, %v335_v47 }
 0x1e3   :  { %v361_v2 = vor.u32 1.1754944e-38, %v360_v61  ;;  %vm359_vm7 = vcmp.eq.f32.partialorder %v358_v63, 8.507059e+37 }
 0x1e4   :  { %v337_v50 = vmul.f32 %v424_v45, %v336_v48 }
 0x1e6   :  { %v426_v52 = vpop.eup %425  ;;  %v338_v53 = vadd.f32 %v424_v45, %v337_v50 }
 0x1e7   :  { %v428_v54 = vpop.eup %427  ;;  %v333_v55 = vadd.f32 1.0, %v426_v52 }
 0x1e8   :  { %v350_v57 = vmul.f32 %v428_v54, %v332_v46  ;;  %v342_v58 = vsel %vm341_vm2, %v424_v45, %v338_v53  ;;  %vm355_vm4 = vweird.f32 %v428_v54 }
 0x1e9   :  { %429 = vrcp.f32 %v333_v55  ;;  %v347_v59 = vsel %vm344_vm3, %v346_v56, %v342_v58  ;;  %vm356_vm6 = vmor %vm354_vm5, %vm355_vm4  ;;  %v375_v7 = vand.u32 2147483648, %v333_v55  ;;  %v373_v9 = vand.u32 2147483647, %v333_v55 }
 0x1ea   :  { %v351_v60 = vsub.f32 1.0, %v350_v57  ;;  %379 = vst [vmem:[#allocation13] sm:$0xff] %v347_v59  ;;  %vm369_vm9 = vweird.f32 %v333_v55 }
 0x1eb   :  { %v376_v11 = vor.u32 1.1754944e-38, %v375_v7  ;;  %vm374_vm11 = vcmp.eq.f32.partialorder %v373_v9, 8.507059e+37 }
 0x1ec   :  { %v352_v62 = vmul.f32 %v428_v54, %v351_v60 }
 0x1ee   :  { %v353_v0 = vadd.f32 %v428_v54, %v352_v62 }
 0x1ef   :  { %v430_v1 = vpop.eup %429 }
 0x1f0   :  { %v365_v3 = vmul.f32 %v430_v1, %v333_v55  ;;  %v357_v4 = vsel %vm356_vm6, %v428_v54, %v353_v0  ;;  %vm370_vm8 = vweird.f32 %v430_v1 }
 0x1f1   :  { %v362_v5 = vsel %vm359_vm7, %v361_v2, %v357_v4  ;;  %vm371_vm10 = vmor %vm369_vm9, %vm370_vm8 }
 0x1f2   :  { %v366_v6 = vsub.f32 1.0, %v365_v3  ;;  %380 = vst [vmem:[#allocation13 + $0x8] sm:$0xff] %v362_v5 }
 0x1f4   :  { %v367_v8 = vmul.f32 %v430_v1, %v366_v6 }
 0x1f6   :  { %v368_v10 = vadd.f32 %v430_v1, %v367_v8 }
 0x1f8   :  { %v372_v12 = vsel %vm371_vm10, %v430_v1, %v368_v10 }
 0x1f9   :  { %v377_v13 = vsel %vm374_vm11, %v376_v11, %v372_v12 }
 0x1fa   :  { %381 = vst [vmem:[#allocation13 + $0x10] sm:$0xff] %v377_v13 }
 0x1fb   :  { %394 = dma.vmem_to_hbm [thread:$0]  %s387_s8, 384, %s389_s1, [#allocation4], %s610_s17, %s610_s17, %s611_s18  }
 0x1fc   :  { %607 = dma.done.wait [#allocation4], 384  }
 0x1fd   :  { %608 = vsyncadd [#allocation4], 4294966912 }
 0x1fe   :  { %399 = vsyncpa [#allocation3], 1 }
 0x1ff   :  { %400 = vsyncpa [#allocation6], 1 }
 0x200   :  { %401 = vsyncpa [#allocation9], 1 }
 0x201   :  { %402 = vsyncpa [#allocation12], 1 }
 0x202   :  { %403 = vsyncpa [#allocation4], 1 }

</bundles_post_ra>
